<compile_context>
chip_gen: v7x
topology: tpu7x:2x2x1
jax: 0.10.0
libtpu: 0.0.40
codegen_flags: <defaults>
</compile_context>

<pallas_src>
import jax
import jax.numpy as jnp
from jax import lax
from jax.experimental import pallas as pl
from jax.experimental.pallas import tpu as pltpu


def _suffix_sum_kernel(x_ref, o_ref, mask_ref):
    # Build the (W, W) mask once per core: mask[k, j] = 1 iff k >= j.
    # The inner ("arbitrary") grid axis runs in order on every core, so each
    # core sees a program_id(1) == 0 step before any compute step it performs.
    @pl.when(pl.program_id(1) == 0)
    def _init_mask():
        k = lax.broadcasted_iota(jnp.int32, mask_ref.shape, 0)
        j = lax.broadcasted_iota(jnp.int32, mask_ref.shape, 1)
        mask_ref[...] = (k >= j).astype(mask_ref.dtype)

    acc = jnp.dot(x_ref[...], mask_ref[...], preferred_element_type=jnp.float32)
    o_ref[...] = acc.astype(o_ref.dtype)


def _vmem_cap_bytes() -> int:
    """Physical VMEM per core; conservative default if the query is unavailable."""
    try:
        info = pltpu.get_tpu_info()
        for name in ("vmem_capacity_bytes", "vmem_size_bytes", "vmem_bytes"):
            v = getattr(info, name, None)
            if v:
                return int(v)
    except Exception:
        pass
    return 64 * 1024 * 1024  # v7x-safe floor


def _choose_block_rows(R: int, W: int, itemsize: int, row_multiple: int) -> int:
    """Large VMEM-capped row tile; >=4 grid steps for big R; dtype-packed rows."""
    if R <= row_multiple:
        return R
    per_buf_cap = 8 * 1024 * 1024  # bytes per (block_rows, W) buffer
    max_by_vmem = max(row_multiple, per_buf_cap // max(1, W * itemsize))
    br = min(1024, max_by_vmem, R)
    # Prefer >= 4 grid steps so pipelining hides DMA, but keep tiles >= 256 rows.
    if R >= 4 * 256:
        br = min(br, max(256, R // 4))
    br = max(row_multiple, (br // row_multiple) * row_multiple)
    return br


def _jnp_ref(x: jax.Array, dim: int) -> jax.Array:
    return jnp.flip(jnp.cumsum(jnp.flip(x, axis=dim), axis=dim), axis=dim)


def suffix_sum(x: jax.Array, *, block_rows: int | None = None) -> jax.Array:
    """Reverse cumulative sum along axis 1 of a 2-D f32/bf16 array (fast path)."""
    assert x.ndim == 2, "kernel handles the 2-D fast path (dim=1)"
    assert x.dtype in (jnp.float32, jnp.bfloat16)
    R, W = x.shape

    compute_dtype = x.dtype  # bf16 stays bf16 on the MXU (f32 accumulation)
    itemsize = jnp.dtype(compute_dtype).itemsize
    row_multiple = 16 if compute_dtype == jnp.bfloat16 else 8

    if block_rows is None:
        block_rows = _choose_block_rows(R, W, itemsize, row_multiple)
    block_rows = min(block_rows, R)
    if block_rows < R:
        block_rows = max(row_multiple, (block_rows // row_multiple) * row_multiple)

    tiles_total = pl.cdiv(R, block_rows)
    # 2-way outer split: shards across TensorCores on v7x, and is just a
    # re-indexing of the same tiles (no extra steps) on single-TC chips.
    splits = 2 if (tiles_total >= 2 and tiles_total % 2 == 0) else 1
    tiles_per_split = tiles_total // splits

    # VMEM budget: double-buffered x/out tiles + resident mask scratch + slack.
    need = 2 * 2 * block_rows * W * itemsize + W * W * itemsize + (2 << 20)
    usable = int(_vmem_cap_bytes() * 0.87)
    if need > usable:
        # TODO(synk): two-level block suffix-sum for large W; fallback for now.
        return _jnp_ref(x, 1)
    vmem_limit = int(min(max(need, 16 * 1024 * 1024), usable))

    cost = pl.CostEstimate(
        flops=2 * R * W * W,
        transcendentals=0,
        bytes_accessed=2 * R * W * itemsize,
    )

    def row_map(s, t):
        return (s * tiles_per_split + t, 0)

    return pl.pallas_call(
        _suffix_sum_kernel,
        out_shape=jax.ShapeDtypeStruct((R, W), x.dtype),
        grid_spec=pltpu.PrefetchScalarGridSpec(
            num_scalar_prefetch=0,
            grid=(splits, tiles_per_split),
            in_specs=[pl.BlockSpec((block_rows, W), row_map)],
            out_specs=pl.BlockSpec((block_rows, W), row_map),
            scratch_shapes=[pltpu.VMEM((W, W), compute_dtype)],
        ),
        compiler_params=pltpu.CompilerParams(
            dimension_semantics=("parallel", "arbitrary"),
            vmem_limit_bytes=vmem_limit,
        ),
        cost_estimate=cost,
    )(x)


def model_forward(x: jax.Array, dim: int = 1) -> jax.Array:
    """Mirror of Model.forward: Pallas fast path for 2-D dim=1 float input."""
    if (
        dim == 1
        and x.ndim == 2
        and (x.shape[1] & 3) == 0
        and x.dtype in (jnp.float32, jnp.bfloat16)
    ):
        return suffix_sum(x)
    # Integer / other dtypes / other dims: exact reference path.
    return _jnp_ref(x, dim)


if __name__ == "__main__":
    key = jax.random.PRNGKey(0)

    # Small 2-D input consistent with the module's fast path (dim=1, W % 4 == 0).
    R, W = 40, 128
    x = jax.random.normal(key, (R, W), dtype=jnp.float32)
    ref = _jnp_ref(x, 1)

    # Default tiling.
    out = jax.block_until_ready(model_forward(x))
    assert out.shape == ref.shape and out.dtype == ref.dtype
    assert jnp.allclose(out, ref, atol=1e-3, rtol=1e-3), "f32 mismatch (default tile)"

    # Forced small tile: 3 tiles including a partial last tile (splits=1 path).
    out_t = jax.block_until_ready(suffix_sum(x, block_rows=16))
    assert jnp.allclose(out_t, ref, atol=1e-3, rtol=1e-3), "f32 mismatch (multi-tile)"

    # bf16: 4 tiles -> 2-way "parallel" outer split, per-core mask init path.
    x_bf = jax.random.normal(jax.random.PRNGKey(1), (64, 128), dtype=jnp.bfloat16)
    ref_bf = _jnp_ref(x_bf.astype(jnp.float32), 1)
    out_bf = jax.block_until_ready(suffix_sum(x_bf, block_rows=16))
    assert out_bf.dtype == jnp.bfloat16
    assert jnp.allclose(
        out_bf.astype(jnp.float32), ref_bf, atol=0.25, rtol=2.5e-2
    ), "bf16 mismatch vs reference"

    # Integer input routes to the exact jnp fallback (correctness concern).
    xi = (jnp.arange(24 * 8, dtype=jnp.int32).reshape(24, 8)) % 7
    out_i = jax.block_until_ready(model_forward(xi))
    assert jnp.array_equal(out_i, _jnp_ref(xi, 1)), "int fallback mismatch"

    print("KERNEL_OK")
</pallas_src>

<mosaic_0001>
module attributes {stable_mosaic.version = 11 : i64} {
  func.func @_suffix_sum_kernel(%arg0: i32, %arg1: i32, %arg2: memref<40x128xf32, #tpu.memory_space<vmem>>, %arg3: memref<40x128xf32, #tpu.memory_space<vmem>>, %arg4: memref<128x128xf32, #tpu.memory_space<vmem>>) attributes {dimension_semantics = [#tpu.dimension_semantics<parallel>, #tpu.dimension_semantics<arbitrary>], iteration_bounds = array<i64: 1, 1>, scalar_prefetch = 0 : i64, scratch_operands = 1 : i64, tpu.core_type = #tpu.core_type<tc>, window_params = [{transform_indices = @transform_0, window_bounds = array<i64: 40, 128>}, {transform_indices = @transform_1, window_bounds = array<i64: 40, 128>}]} {
    %c0_i32 = arith.constant 0 : i32
    %0 = arith.cmpi eq, %arg1, %c0_i32 : i32
    %1 = arith.extui %0 : i1 to i32
    %c0_i32_0 = arith.constant 0 : i32
    %2 = arith.cmpi ne, %1, %c0_i32_0 : i32
    scf.if %2 {
      %7 = tpu.iota {dimensions = array<i32: 0>} : vector<128x128xi32>
      %8 = tpu.iota {dimensions = array<i32: 1>} : vector<128x128xi32>
      %9 = arith.cmpi sge, %7, %8 : vector<128x128xi32>
      %10 = arith.extui %9 : vector<128x128xi1> to vector<128x128xi32>
      %11 = arith.sitofp %10 : vector<128x128xi32> to vector<128x128xf32>
      %c0_6 = arith.constant 0 : index
      %c0_7 = arith.constant 0 : index
      %12 = vector.load %arg4[%c0_6, %c0_7] : memref<128x128xf32, #tpu.memory_space<vmem>>, vector<128x128xf32>
      tpu.vector_store %arg4[%c0_6, %c0_7], %11 {strides = array<i32>} : memref<128x128xf32, #tpu.memory_space<vmem>>, vector<128x128xf32>,
    } else {
    }
    %c0 = arith.constant 0 : index
    %c0_1 = arith.constant 0 : index
    %3 = vector.load %arg2[%c0, %c0_1] : memref<40x128xf32, #tpu.memory_space<vmem>>, vector<40x128xf32>
    %c0_2 = arith.constant 0 : index
    %c0_3 = arith.constant 0 : index
    %4 = vector.load %arg4[%c0_2, %c0_3] : memref<128x128xf32, #tpu.memory_space<vmem>>, vector<128x128xf32>
    %cst = arith.constant dense<0.000000e+00> : vector<40x128xf32>
    %5 = tpu.matmul %3, %4, %cst {dimension_numbers = #tpu.dot_dimension_numbers<[1], [0], [0], [1], [0, 0, 1, 1], [], []>} : vector<40x128xf32>, vector<128x128xf32>, vector<40x128xf32> -> vector<40x128xf32>
    %c0_4 = arith.constant 0 : index
    %c0_5 = arith.constant 0 : index
    %6 = vector.load %arg3[%c0_4, %c0_5] : memref<40x128xf32, #tpu.memory_space<vmem>>, vector<40x128xf32>
    tpu.vector_store %arg3[%c0_4, %c0_5], %5 {strides = array<i32>} : memref<40x128xf32, #tpu.memory_space<vmem>>, vector<40x128xf32>,
    return
  }
  func.func @transform_0(%arg0: i32, %arg1: i32) -> (i32, i32) {
    %c1_i32 = arith.constant 1 : i32
    %0 = arith.muli %arg0, %c1_i32 : i32
    %1 = arith.addi %0, %arg1 : i32
    %c0_i32 = arith.constant 0 : i32
    %c0_i32_0 = arith.constant 0 : i32
    return %1, %c0_i32 : i32, i32
  }
  func.func @transform_1(%arg0: i32, %arg1: i32) -> (i32, i32) {
    %c1_i32 = arith.constant 1 : i32
    %0 = arith.muli %arg0, %c1_i32 : i32
    %1 = arith.addi %0, %arg1 : i32
    %c0_i32 = arith.constant 0 : i32
    %c0_i32_0 = arith.constant 0 : i32
    return %1, %c0_i32 : i32, i32
  }
}

</mosaic_0001>

<bundles_post_ra>
// kernel: tpu_custom_call.1
= control target key start
LH: loop header
LB: loop body
LE: loop exit
PB: predicated region body
PF: predicated region fallthrough
CT: control target
= control target key end

     0   :  { %6 = vsyncpa [#allocation4], 0  ;;  %s543_s0 = inlined_call_operand.hbm [shape: f32[40,128], index: 0, kind: input, shape index: {}]   ;;  %s544_s1 = inlined_call_operand.hbm [shape: f32[40,128], index: 1, kind: output, shape index: {}]  }
   0x1   :  { %7 = vsyncpa [#allocation5], 0  ;;  %s451_s6 = smov [#allocation3]   ;;  %s403_s10 = scalar_lea.hbm %s543_s0, 640 }
   0x2   :  { %s17_s7 = sshll.u32 %s451_s6, 4  ;;  %p404_p0 = scmp.ne.s32.totalorder %s543_s0, %s403_s10  ;;  %s18_s7 = int_to_ptr.vmem [resolvable:$true] %s17_s7 }
   0x3   :  { %p407_p1 = scmp.lt.u32.totalorder %s403_s10, %s543_s0 }
   0x5   :  { %p409_p2 = pnand %p407_p1, %p404_p0 }
   0x7   :  { %412 = shalt.err (!%p409_p2)
}
   0x8   :  { %s413_s15 = scalar_lea.vmem %s18_s7, 640  ;;  %p418_p4 = scmp.lt.s32.totalorder %s18_s7, %s18_s7 }
   0x9   :  { %p414_p3 = scmp.ne.s32.totalorder %s18_s7, %s413_s15  ;;  %p419_p5 = scmp.lt.s32.totalorder %s413_s15, %s413_s15 }
   0xb   :  { %p420_p6 = por %p419_p5, %p418_p4 }
   0xd   :  { %p421_p7 = pnand %p420_p6, %p414_p3 }
   0xf   :  { %424 = shalt.err (!%p421_p7)
}
  0x10   :  { %s452_s16 = smov 128   ;;  %s453_s17 = smov 8   ;;  %v35_v0 = vlaneseq }
  0x11   :  { %23 = dma.hbm_to_vmem [thread:$0]  %s543_s0, 640, %s18_s7, [#allocation4], %s452_s16, %s452_s16, %s453_s17  }
  0x12   :  { %447 = dma.done.wait [#allocation4], 640  }
  0x13   :  { %448 = vsyncadd [#allocation4], 4294966656  ;;  %v454_v1 = vmov 0.0|0.0   ;;  %v36_v2 = vshrl.u32 %v35_v0, 7  ;;  %v486_v3 = vand.u32 127, %v35_v0  ;;  %vm455_vm0 = vmmov 0  }
  0x14   :  { %355 = vmatprep.subr.bf16.mxu0 %v454_v1  ;;  %379 = vmatprep.subr.bf16.mxu1 %v454_v1  ;;  %v456_v4 = vmov 0.0   ;;  %v457_v10 = vmov 1.0|1.0   ;;  %v118_v21 = vld [vmem:[#allocation3] sm:$0xff]  ;;  %v121_v22 = vld [vmem:[#allocation3 + $0x18] sm:$0xff]  ;;  %v119_v23 = vld [vmem:[#allocation3 + $0x8] sm:$0xff] }
  0x15   :  { %340 = vmatprep.mubr.msk.f32.mxu0 %vm455_vm0, %v456_v4  ;;  %349 = vmatprep.mubr.msk.f32.mxu1 %vm455_vm0, %v456_v4  ;;  %v37_v5 = vadd.s32 8, %v36_v2  ;;  %vm54_vm1 = vcmp.ge.s32.totalorder %v36_v2, %v486_v3  ;;  %v38_v6 = vadd.s32 16, %v36_v2  ;;  %v39_v7 = vadd.s32 24, %v36_v2  ;;  %v122_v24 = vld [vmem:[#allocation3 + $0x20] sm:$0xff]  ;;  %v120_v25 = vld [vmem:[#allocation3 + $0x10] sm:$0xff]  ;;  %s458_s0 = smov [#allocation6]  }
  0x16   :  { %v40_v8 = vadd.s32 32, %v36_v2  ;;  %v41_v9 = vadd.s32 40, %v36_v2  ;;  %v42_v11 = vadd.s32 48, %v36_v2  ;;  %v43_v12 = vadd.s32 56, %v36_v2  ;;  %s243_s20 = sshll.u32 %s458_s0, 4  ;;  %s244_s20 = int_to_ptr.vmem [resolvable:$true] %s243_s20 }
  0x17   :  { %vm55_vm2 = vcmp.ge.s32.totalorder %v37_v5, %v486_v3  ;;  %vm56_vm3 = vcmp.ge.s32.totalorder %v38_v6, %v486_v3  ;;  %vm57_vm4 = vcmp.ge.s32.totalorder %v39_v7, %v486_v3  ;;  %v44_v13 = vadd.s32 64, %v36_v2  ;;  %s425_s21 = scalar_lea.vmem %s244_s20, 640  ;;  %p430_p9 = scmp.lt.s32.totalorder %s244_s20, %s244_s20 }
  0x18   :  { %vm356_vm5 = vmpackc.low %vm55_vm2, %vm54_vm1  ;;  %vm58_vm7 = vcmp.ge.s32.totalorder %v40_v8, %v486_v3  ;;  %vm59_vm8 = vcmp.ge.s32.totalorder %v41_v9, %v486_v3  ;;  %vm60_vm10 = vcmp.ge.s32.totalorder %v42_v11, %v486_v3  ;;  %vm61_vm11 = vcmp.ge.s32.totalorder %v43_v12, %v486_v3  ;;  %p426_p8 = scmp.ne.s32.totalorder %s244_s20, %s425_s21  ;;  %p431_p10 = scmp.lt.s32.totalorder %s425_s21, %s425_s21 }
  0x19   :  { %357 = vmatpush3.bf16.msk.msra.mxu0 %vm356_vm5, %v457_v10  ;;  %387 = vmatpush3.bf16.msk.msra.mxu1 %vm356_vm5, %v457_v10  ;;  %vm359_vm6 = vmpackc.low %vm57_vm4, %vm56_vm3  ;;  %v45_v14 = vadd.s32 72, %v36_v2  ;;  %vm62_vm13 = vcmp.ge.s32.totalorder %v44_v13, %v486_v3  ;;  %v46_v15 = vadd.s32 80, %v36_v2  ;;  %v47_v16 = vadd.s32 88, %v36_v2 }
  0x1a   :  { %358 = vmatprep.subr.bf16.mxu0 %v454_v1  ;;  %380 = vmatprep.subr.bf16.mxu1 %v454_v1  ;;  %vm362_vm9 = vmpackc.low %vm59_vm8, %vm58_vm7  ;;  %v48_v17 = vadd.s32 96, %v36_v2  ;;  %v49_v18 = vadd.s32 104, %v36_v2  ;;  %v50_v19 = vadd.s32 112, %v36_v2  ;;  %v51_v20 = vadd.s32 120, %v36_v2  ;;  %p432_p11 = por %p431_p10, %p430_p9 }
  0x1b   :  { %vm365_vm12 = vmpackc.low %vm61_vm11, %vm60_vm10  ;;  %vm63_vm14 = vcmp.ge.s32.totalorder %v45_v14, %v486_v3  ;;  %vm64_vm1 = vcmp.ge.s32.totalorder %v46_v15, %v486_v3  ;;  %vm65_vm2 = vcmp.ge.s32.totalorder %v47_v16, %v486_v3 }
  0x1c   :  { %vm368_vm15 = vmpackc.low %vm63_vm14, %vm62_vm13  ;;  %vm66_vm4 = vcmp.ge.s32.totalorder %v48_v17, %v486_v3  ;;  %vm67_vm5 = vcmp.ge.s32.totalorder %v49_v18, %v486_v3  ;;  %vm68_vm7 = vcmp.ge.s32.totalorder %v50_v19, %v486_v3  ;;  %vm69_vm8 = vcmp.ge.s32.totalorder %v51_v20, %v486_v3  ;;  %p433_p12 = pnand %p432_p11, %p426_p8 }
  0x1d   :  { %360 = vmatpush3.bf16.msk.msra.mxu0 %vm359_vm6, %v457_v10  ;;  %388 = vmatpush3.bf16.msk.msra.mxu1 %vm359_vm6, %v457_v10  ;;  %vm371_vm3 = vmpackc.low %vm65_vm2, %vm64_vm1 }
  0x1e   :  { %361 = vmatprep.subr.bf16.mxu0 %v454_v1  ;;  %381 = vmatprep.subr.bf16.mxu1 %v454_v1  ;;  %vm374_vm6 = vmpackc.low %vm67_vm5, %vm66_vm4 }
  0x21   :  { %363 = vmatpush3.bf16.msk.msra.mxu0 %vm362_vm9, %v457_v10  ;;  %389 = vmatpush3.bf16.msk.msra.mxu1 %vm362_vm9, %v457_v10  ;;  %vm377_vm9 = vmpackc.low %vm69_vm8, %vm68_vm7 }
  0x22   :  { %364 = vmatprep.subr.bf16.mxu0 %v454_v1  ;;  %382 = vmatprep.subr.bf16.mxu1 %v454_v1 }
  0x25   :  { %366 = vmatpush3.bf16.msk.msra.mxu0 %vm365_vm12, %v457_v10  ;;  %390 = vmatpush3.bf16.msk.msra.mxu1 %vm365_vm12, %v457_v10 }
  0x26   :  { %367 = vmatprep.subr.bf16.mxu0 %v454_v1  ;;  %383 = vmatprep.subr.bf16.mxu1 %v454_v1 }
  0x29   :  { %369 = vmatpush3.bf16.msk.msra.mxu0 %vm368_vm15, %v457_v10  ;;  %391 = vmatpush3.bf16.msk.msra.mxu1 %vm368_vm15, %v457_v10 }
  0x2a   :  { %370 = vmatprep.subr.bf16.mxu0 %v454_v1  ;;  %384 = vmatprep.subr.bf16.mxu1 %v454_v1 }
  0x2d   :  { %372 = vmatpush3.bf16.msk.msra.mxu0 %vm371_vm3, %v457_v10  ;;  %392 = vmatpush3.bf16.msk.msra.mxu1 %vm371_vm3, %v457_v10 }
  0x2e   :  { %373 = vmatprep.subr.bf16.mxu0 %v454_v1  ;;  %385 = vmatprep.subr.bf16.mxu1 %v454_v1 }
  0x31   :  { %375 = vmatpush3.bf16.msk.msra.mxu0 %vm374_vm6, %v457_v10  ;;  %393 = vmatpush3.bf16.msk.msra.mxu1 %vm374_vm6, %v457_v10 }
  0x32   :  { %376 = vmatprep.subr.bf16.mxu0 %v454_v1  ;;  %386 = vmatprep.subr.bf16.mxu1 %v454_v1 }
  0x35   :  { %378 = vmatpush3.bf16.msk.msra.mxu0 %vm377_vm9, %v457_v10  ;;  %394 = vmatpush3.bf16.msk.msra.mxu1 %vm377_vm9, %v457_v10 }
  0x38   :  { %341 = vmatmul.mubr.f32.vlgmr.msra.gmra.mrb[0].mxu0 %v118_v21  ;;  %350 = vmatmul.mubr.f32.vlgmr.msra.gmra.mrb[0].mxu1 %v121_v22 }
  0x39   :  { %343 = vmatprep.mubr.msk.f32.mxu0 %vm455_vm0, %v456_v4  ;;  %352 = vmatprep.mubr.msk.f32.mxu1 %vm455_vm0, %v456_v4 }
  0x3c   :  { %344 = vmatmul.mubr.f32.gmra.mrb[2].mxu0 %v119_v23  ;;  %353 = vmatmul.mubr.f32.gmra.mrb[2].mxu1 %v122_v24 }
  0x3d   :  { %346 = vmatprep.mubr.msk.f32.mxu0 %vm455_vm0, %v456_v4 }
  0x40   :  { %347 = vmatmul.mubr.f32.gmra.mrb[4].mxu0 %v120_v25 }
 0x10b   :  { %v205_v26 = vpop.f32.mrb[0].mxu0  ;;  %v220_v27 = vpop.f32.mrb[0].mxu1 }
 0x10c   :  { %229 = vst [vmem:[#allocation6] sm:$0xff] %v205_v26  ;;  %v342_v28 = vpop.f32.mrb[1].mxu0  ;;  %232 = vst [vmem:[#allocation6 + $0x18] sm:$0xff] %v220_v27  ;;  %v351_v29 = vpop.f32.mrb[1].mxu1 }
 0x10f   :  { %v210_v30 = vpop.f32.mrb[2].mxu0  ;;  %v225_v31 = vpop.f32.mrb[2].mxu1 }
 0x110   :  { %230 = vst [vmem:[#allocation6 + $0x8] sm:$0xff] %v210_v30  ;;  %v345_v32 = vpop.f32.mrb[3].mxu0  ;;  %233 = vst [vmem:[#allocation6 + $0x20] sm:$0xff] %v225_v31  ;;  %v354_v33 = vpop.f32.mrb[3].mxu1 }
 0x113   :  { %v215_v34 = vpop.f32.mrb[4].mxu0 }
 0x114   :  { %231 = vst [vmem:[#allocation6 + $0x10] sm:$0xff] %v215_v34  ;;  %v348_v35 = vpop.f32.mrb[5].mxu0 }
 0x115   :  { %436 = shalt.err (!%p433_p12)
}
 0x116   :  { %s437_s24 = scalar_lea.hbm %s544_s1, 640 }
 0x117   :  { %p438_p13 = scmp.ne.s32.totalorder %s544_s1, %s437_s24  ;;  %p441_p0 = scmp.lt.u32.totalorder %s437_s24, %s544_s1 }
 0x119   :  { %p443_p1 = pnand %p441_p0, %p438_p13 }
 0x11b   :  { %446 = shalt.err (!%p443_p1)
}
 0x11c   :  { %249 = dma.vmem_to_hbm [thread:$0]  %s244_s20, 640, %s544_s1, [#allocation5], %s452_s16, %s452_s16, %s453_s17  }
 0x11d   :  { %449 = dma.done.wait [#allocation5], 640  }
 0x11e   :  { %450 = vsyncadd [#allocation5], 4294966656 }
 0x11f   :  { %253 = vsyncpa [#allocation4], 1 }
 0x120   :  { %254 = vsyncpa [#allocation5], 1 }

</bundles_post_ra>
